<compile_context>
chip_gen: v6e
topology: v6e:2x2x1
jax: 0.10.0
libtpu: 0.0.40
codegen_flags: <defaults>
</compile_context>

<pallas_src>
import numpy as np
import jax
import jax.numpy as jnp
from jax.experimental import pallas as pl
from jax.experimental.pallas import tpu as pltpu


# ----------------------------------------------------------------------------
# Small helpers (host side)
# ----------------------------------------------------------------------------
def _round_up(x, m):
    return ((x + m - 1) // m) * m


def _vmem_capacity_bytes():
    try:
        info = pltpu.get_tpu_info()
        cap = int(getattr(info, "vmem_capacity_bytes", 0) or 0)
        if cap > 0:
            return cap
    except Exception:
        pass
    return 64 * 1024 * 1024          # conservative (v7x-sized) fallback


def _num_tensorcores():
    try:
        kind = jax.devices()[0].device_kind.lower()
        return 2 if "v7" in kind else 1
    except Exception:
        return 1


def _vmem_limit_bytes():
    return min(int(_vmem_capacity_bytes() * 0.8), 100 * 1024 * 1024)


def _pick_batch_tile(batch, per_col_bytes, max_bt=512):
    """Lane-axis batch tile: multiple of 128, sized from the chip's actual VMEM
    capacity (per_col_bytes already accounts for lane-resident scratch), and on
    multi-TensorCore chips shrunk so the 'parallel' grid has >= 2 tiles."""
    cap = _vmem_capacity_bytes()
    budget = max(int(cap * 0.45), 8 * 1024 * 1024)
    bt = 128
    while bt + 128 <= max_bt and (bt + 128) * per_col_bytes <= budget:
        bt += 128
    bp128 = _round_up(batch, 128)
    bt = min(bt, bp128)
    if _num_tensorcores() >= 2 and bp128 >= 256:
        while bt > 128 and _round_up(batch, bt) < 2 * bt:
            bt -= 128
    return bt


# ----------------------------------------------------------------------------
# In-kernel building blocks (batch-on-lanes layout)
# ----------------------------------------------------------------------------
def _project_inputs(x_ref, wih_ref, bih_ref, gx_scr, n_steps):
    """gx[t] = W_ih_comb @ x[t] + b_ih_comb for t < n_steps (per-tile bound).
    x_ref: [T, D, bt] bf16 (features on sublanes, batch on lanes),
    gx_scr: [T, 6H, bt] f32 (rows 0:3H = fwd gates r|z|n, rows 3H:6H = bwd)."""
    D, bt = x_ref.shape[1], x_ref.shape[2]
    H6 = gx_scr.shape[1]
    wih = wih_ref[...]            # [6H, D] bf16
    bih = bih_ref[...]            # [6H, 1] f32

    def body(t, carry):
        x_t = x_ref[pl.ds(t, 1), :, :].reshape(D, bt)
        gx_scr[pl.ds(t, 1), :, :] = (
            jnp.dot(wih, x_t, preferred_element_type=jnp.float32) + bih
        ).reshape(1, H6, bt)
        return carry

    jax.lax.fori_loop(0, n_steps, body, 0)


def _gru_gates(gx, gh, h, H):
    """PyTorch GRU cell (gate order r, z, n); operands are [*, bt] lane-major."""
    r = jax.nn.sigmoid(gx[0:H] + gh[0:H])
    z = jax.nn.sigmoid(gx[H:2 * H] + gh[H:2 * H])
    n = jnp.tanh(gx[2 * H:3 * H] + r * gh[2 * H:3 * H])
    return (1.0 - z) * n + z * h


def _fused_bigru_scan(gx_scr, lens, whh_c, bhh_c, n_steps, outs_scr=None):
    """Serial bi-GRU recurrence, batch on lanes.
    Carry h_all = [h_fwd; h_bwd] : [2H, bt]; a single block-diagonal
    [6H,2H] @ [2H,bt] MXU matmul per step covers both directions.  Length
    masking (freeze past the last valid step) reproduces pack_padded_sequence
    semantics for both outputs and final states."""
    H6, bt = gx_scr.shape[1], gx_scr.shape[2]
    H = H6 // 6
    H3 = 3 * H

    def step(i, h_all):
        tb = n_steps - 1 - i
        gh = jnp.dot(whh_c, h_all, preferred_element_type=jnp.float32) + bhh_c
        gx_f = gx_scr[pl.ds(i, 1), 0:H3, :].reshape(H3, bt)
        gx_b = gx_scr[pl.ds(tb, 1), H3:H6, :].reshape(H3, bt)
        h_f = jnp.where(i < lens,
                        _gru_gates(gx_f, gh[0:H3], h_all[0:H], H),
                        h_all[0:H])
        h_b = jnp.where(tb < lens,
                        _gru_gates(gx_b, gh[H3:H6], h_all[H:2 * H], H),
                        h_all[H:2 * H])
        if outs_scr is not None:
            outs_scr[pl.ds(i, 1), 0:H, :] = h_f.reshape(1, H, bt)
            outs_scr[pl.ds(tb, 1), H:2 * H, :] = h_b.reshape(1, H, bt)
        return jnp.concatenate([h_f, h_b], axis=0)

    h0 = jnp.zeros((2 * H, bt), jnp.float32)
    return jax.lax.fori_loop(0, n_steps, step, h0)


# ----------------------------------------------------------------------------
# Kernel 1: AttendedSeqEmbedding (bi-GRU + MLP + context attention)
# ----------------------------------------------------------------------------
def _attended_kernel(maxlen_ref, lens_ref, x_ref,
                     wih_ref, bih_ref, whh_ref, bhh_ref,
                     wmlp_ref, bmlp_ref, ctx_ref,
                     out_ref, gx_scr, outs_scr):
    H2, bt = out_ref.shape
    n_steps = maxlen_ref[pl.program_id(0)]          # per-tile max length (SMEM)
    lens = lens_ref[...]                            # [1, bt] int32

    _project_inputs(x_ref, wih_ref, bih_ref, gx_scr, n_steps)
    _fused_bigru_scan(gx_scr, lens, whh_ref[...], bhh_ref[...], n_steps,
                      outs_scr=outs_scr)

    # Online-softmax attention epilogue over the valid steps of this tile:
    #   logit[t] = ctx . tanh(W_mlp @ [h_f(t); h_b(t)] + b_mlp)
    #   out      = sum_t softmax(logit)[t] * [h_f(t); h_b(t)]
    w_mlp = wmlp_ref[...]       # [E, 2H] f32
    b_mlp = bmlp_ref[...]       # [E, 1]
    ctx = ctx_ref[...]          # [E, 1]

    def attn_step(t, carry):
        m, l, acc = carry
        outs_t = outs_scr[pl.ds(t, 1), :, :].reshape(H2, bt)
        mlp_t = jnp.tanh(
            jnp.dot(w_mlp, outs_t, preferred_element_type=jnp.float32) + b_mlp)
        a_t = jnp.sum(mlp_t * ctx, axis=0, keepdims=True)        # [1, bt]
        valid = t < lens
        a_m = jnp.where(valid, a_t, -1e30)
        m_new = jnp.maximum(m, a_m)
        scale = jnp.exp(m - m_new)
        e_t = jnp.where(valid, jnp.exp(a_m - m_new), 0.0)
        return (m_new, scale * l + e_t, scale * acc + e_t * outs_t)

    m0 = jnp.full((1, bt), -1e30, jnp.float32)
    l0 = jnp.zeros((1, bt), jnp.float32)
    acc0 = jnp.zeros((H2, bt), jnp.float32)
    _, l, acc = jax.lax.fori_loop(0, n_steps, attn_step, (m0, l0, acc0))

    out_ref[...] = acc / jnp.maximum(l, 1e-20)      # guard fully-padded columns


def attended_seq_embedding(x_pad, lens, p):
    """x_pad: [B, T, D] batch-major padded, lens: [B] int32 -> [B, 2H] f32."""
    B, T, D = x_pad.shape
    H = p['whh_c'].shape[1] // 2
    E = p['b_mlp'].shape[0]

    # lane-padded per-lane-column VMEM bytes (double-buffered bf16 x block +
    # f32 gate / rnn-output scratch)
    per_col = T * (2 * 2 * D + 4 * 6 * H + 4 * 2 * H)
    bt = _pick_batch_tile(B, per_col)
    Bp = _round_up(B, bt)
    G = Bp // bt

    x_tm = jnp.transpose(x_pad.astype(jnp.bfloat16), (1, 2, 0))   # [T, D, B]
    x_tm = jnp.pad(x_tm, ((0, 0), (0, 0), (0, Bp - B)))
    lens_p = jnp.pad(lens.astype(jnp.int32), (0, Bp - B))
    lens_row = lens_p.reshape(1, Bp)
    tile_maxlen = jnp.max(lens_p.reshape(G, bt), axis=1).astype(jnp.int32)

    out_t = pl.pallas_call(
        _attended_kernel,
        out_shape=jax.ShapeDtypeStruct((2 * H, Bp), jnp.float32),
        grid_spec=pltpu.PrefetchScalarGridSpec(
            num_scalar_prefetch=1,
            grid=(G,),
            in_specs=[
                pl.BlockSpec((1, bt), lambda b, ml: (0, b)),          # lens
                pl.BlockSpec((T, D, bt), lambda b, ml: (0, 0, b)),    # x [T,D,bt]
                pl.BlockSpec((6 * H, D), lambda b, ml: (0, 0)),       # wih_c bf16
                pl.BlockSpec((6 * H, 1), lambda b, ml: (0, 0)),       # bih_c
                pl.BlockSpec((6 * H, 2 * H), lambda b, ml: (0, 0)),   # whh_c
                pl.BlockSpec((6 * H, 1), lambda b, ml: (0, 0)),       # bhh_c
                pl.BlockSpec((E, 2 * H), lambda b, ml: (0, 0)),       # w_mlp
                pl.BlockSpec((E, 1), lambda b, ml: (0, 0)),           # b_mlp
                pl.BlockSpec((E, 1), lambda b, ml: (0, 0)),           # ctx
            ],
            out_specs=pl.BlockSpec((2 * H, bt), lambda b, ml: (0, b)),
            scratch_shapes=[pltpu.VMEM((T, 6 * H, bt), jnp.float32),
                            pltpu.VMEM((T, 2 * H, bt), jnp.float32)],
        ),
        compiler_params=pltpu.CompilerParams(
            dimension_semantics=("parallel",),
            vmem_limit_bytes=_vmem_limit_bytes()),
    )(tile_maxlen, lens_row, x_tm,
      p['wih_c'], p['bih_c'], p['whh_c'], p['bhh_c'],
      p['w_mlp'], p['b_mlp'], p['ctx'])
    return out_t.T[:B]


# ----------------------------------------------------------------------------
# Kernel 2: summary bi-GRU final states + classifier + softmax (fused)
# ----------------------------------------------------------------------------
def _summary_classifier_kernel(maxlen_ref, lens_ref, x_ref,
                               wih_ref, bih_ref, whh_ref, bhh_ref,
                               rev_ref, wrev_ref, wsum_ref, bcls_ref,
                               out_ref, gx_scr):
    n_steps = maxlen_ref[pl.program_id(0)]
    lens = lens_ref[...]                            # [1, bt] int32

    _project_inputs(x_ref, wih_ref, bih_ref, gx_scr, n_steps)
    h_all = _fused_bigru_scan(gx_scr, lens, whh_ref[...], bhh_ref[...], n_steps)

    # classifier on cat([review_emb, h_fwd, h_bwd]) + softmax over classes,
    # with the classifier weight pre-split by input block (no concatenate).
    logits = (jnp.dot(wrev_ref[...], rev_ref[...],
                      preferred_element_type=jnp.float32)
              + jnp.dot(wsum_ref[...], h_all,
                        preferred_element_type=jnp.float32)
              + bcls_ref[...])                      # [C, bt]
    m = jnp.max(logits, axis=0, keepdims=True)
    e = jnp.exp(logits - m)
    out_ref[...] = e / jnp.sum(e, axis=0, keepdims=True)


def summary_classifier(x_pad, lens, review_embs, gru_p, wcls_rev, wcls_s, bcls):
    B, T, D = x_pad.shape
    H = gru_p['whh_c'].shape[1] // 2
    C, emb = wcls_rev.shape

    per_col = T * (2 * 2 * D + 4 * 6 * H) + 2 * 4 * emb
    bt = _pick_batch_tile(B, per_col)
    Bp = _round_up(B, bt)
    G = Bp // bt

    x_tm = jnp.transpose(x_pad.astype(jnp.bfloat16), (1, 2, 0))   # [T, D, B]
    x_tm = jnp.pad(x_tm, ((0, 0), (0, 0), (0, Bp - B)))
    lens_p = jnp.pad(lens.astype(jnp.int32), (0, Bp - B))
    lens_row = lens_p.reshape(1, Bp)
    tile_maxlen = jnp.max(lens_p.reshape(G, bt), axis=1).astype(jnp.int32)
    rev_t = jnp.pad(jnp.transpose(review_embs.astype(jnp.float32)),
                    ((0, 0), (0, Bp - B)))                        # [emb, Bp]

    out_t = pl.pallas_call(
        _summary_classifier_kernel,
        out_shape=jax.ShapeDtypeStruct((C, Bp), jnp.float32),
        grid_spec=pltpu.PrefetchScalarGridSpec(
            num_scalar_prefetch=1,
            grid=(G,),
            in_specs=[
                pl.BlockSpec((1, bt), lambda b, ml: (0, b)),          # lens
                pl.BlockSpec((T, D, bt), lambda b, ml: (0, 0, b)),    # x
                pl.BlockSpec((6 * H, D), lambda b, ml: (0, 0)),       # wih_c bf16
                pl.BlockSpec((6 * H, 1), lambda b, ml: (0, 0)),       # bih_c
                pl.BlockSpec((6 * H, 2 * H), lambda b, ml: (0, 0)),   # whh_c
                pl.BlockSpec((6 * H, 1), lambda b, ml: (0, 0)),       # bhh_c
                pl.BlockSpec((emb, bt), lambda b, ml: (0, b)),        # review_emb^T
                pl.BlockSpec((C, emb), lambda b, ml: (0, 0)),         # wcls (review)
                pl.BlockSpec((C, 2 * H), lambda b, ml: (0, 0)),       # wcls (summary)
                pl.BlockSpec((C, 1), lambda b, ml: (0, 0)),           # b_cls
            ],
            out_specs=pl.BlockSpec((C, bt), lambda b, ml: (0, b)),
            scratch_shapes=[pltpu.VMEM((T, 6 * H, bt), jnp.float32)],
        ),
        compiler_params=pltpu.CompilerParams(
            dimension_semantics=("parallel",),
            vmem_limit_bytes=_vmem_limit_bytes()),
    )(tile_maxlen, lens_row, x_tm,
      gru_p['wih_c'], gru_p['bih_c'], gru_p['whh_c'], gru_p['bhh_c'],
      rev_t, wcls_rev, wcls_s, bcls)
    return out_t.T[:B]


# ----------------------------------------------------------------------------
# Parameter construction (weights stored in the kernel-consumed layout:
# [out_features, in_features] so gates are computed as W @ x with batch on
# lanes; input-projection weights pre-cast to bf16, recurrence stays f32)
# ----------------------------------------------------------------------------
def _normal(key, shape, scale=0.1):
    return scale * jax.random.normal(key, shape, dtype=jnp.float32)


def make_gru_params(key, input_dim, hidden_dim):
    H = hidden_dim
    H3 = 3 * H
    ks = jax.random.split(key, 8)
    wih_f = _normal(ks[0], (H3, input_dim))
    whh_f = _normal(ks[1], (H3, H))
    bih_f = _normal(ks[2], (H3, 1))
    bhh_f = _normal(ks[3], (H3, 1))
    wih_b = _normal(ks[4], (H3, input_dim))
    whh_b = _normal(ks[5], (H3, H))
    bih_b = _normal(ks[6], (H3, 1))
    bhh_b = _normal(ks[7], (H3, 1))
    z = jnp.zeros((H3, H), jnp.float32)
    return dict(
        # stacked fwd|bwd input-gate weights (bf16 for the MXU)
        wih_c=jnp.concatenate([wih_f, wih_b], axis=0).astype(jnp.bfloat16),
        bih_c=jnp.concatenate([bih_f, bih_b], axis=0),
        # block-diagonal hidden-gate weight -> one [6H,2H]@[2H,bt] matmul/step
        whh_c=jnp.concatenate([jnp.concatenate([whh_f, z], axis=1),
                               jnp.concatenate([z, whh_b], axis=1)], axis=0),
        bhh_c=jnp.concatenate([bhh_f, bhh_b], axis=0),
    )


def make_attended_params(key, input_dim, hidden_dim, output_dim):
    k1, k2, k3, k4 = jax.random.split(key, 4)
    p = make_gru_params(k1, input_dim, hidden_dim)
    p['w_mlp'] = _normal(k2, (output_dim, 2 * hidden_dim))   # nn.Linear(2H, E).weight
    p['b_mlp'] = _normal(k3, (output_dim, 1))
    p['ctx'] = _normal(k4, (output_dim, 1))                  # context vector
    return p


def make_han_params(key, review_vocab, summary_vocab, word_emb_dim,
                    rnn_hidden_dim, emb_dim, output_dim):
    assert 2 * rnn_hidden_dim == emb_dim, "HAN requires emb_dim == 2*rnn_hidden_dim"
    ks = jax.random.split(key, 10)
    H = rnn_hidden_dim
    review_lookup = _normal(ks[0], (review_vocab, word_emb_dim)).at[1].set(0.0)
    summary_lookup = _normal(ks[1], (summary_vocab, word_emb_dim)).at[1].set(0.0)
    return dict(
        emb_dim=emb_dim,
        review_lookup=review_lookup,
        summary_lookup=summary_lookup,
        review_sent_emb=make_attended_params(ks[2], word_emb_dim, H, emb_dim),
        review_emb=make_attended_params(ks[3], emb_dim, H, emb_dim),
        summary_rnn=make_gru_params(ks[4], word_emb_dim, H),
        empty_review_emb=_normal(ks[5], (emb_dim,)),     # unused: all lens > 0
        empty_summary_emb=_normal(ks[6], (emb_dim,)),    # unused: all lens > 0
        # nn.Linear(2*emb, C) weight, split by input block: [review | summary]
        wcls_rev=_normal(ks[7], (output_dim, emb_dim)),
        wcls_s=_normal(ks[8], (output_dim, 2 * H)),
        b_cls=_normal(ks[9], (output_dim, 1)),
    )


# ----------------------------------------------------------------------------
# HAN forward (glue = lookups / vectorized padding; hot paths in the kernels)
# ----------------------------------------------------------------------------
def han_forward(params, reviews, summaries):
    emb_dim = params['emb_dim']

    # ----- level 1: words -> sentence embeddings (all sentences flattened)
    sents = [sent for review in reviews for sent in review]
    sentlens = np.array([len(s) for s in sents], dtype=np.int32)
    NS, T_w = len(sents), int(sentlens.max())
    sent_ids = np.zeros((NS, T_w), dtype=np.int32)
    for i, s in enumerate(sents):
        sent_ids[i, :len(s)] = np.asarray(s, dtype=np.int32)
    sent_word_embs = params['review_lookup'][jnp.asarray(sent_ids)]   # [NS,Tw,Dw]
    sent_embs = attended_seq_embedding(sent_word_embs, jnp.asarray(sentlens),
                                       params['review_sent_emb'])     # [NS, emb]

    # ----- level 2: sentence embeddings -> review embeddings (single scatter)
    reviewlens = np.array([len(r) for r in reviews], dtype=np.int32)
    NR, T_s = len(reviews), int(reviewlens.max())
    rev_idx = np.repeat(np.arange(NR, dtype=np.int32), reviewlens)
    pos_idx = np.concatenate([np.arange(l, dtype=np.int32) for l in reviewlens])
    rev_inp = jnp.zeros((NR, T_s, emb_dim), jnp.float32).at[
        (jnp.asarray(rev_idx), jnp.asarray(pos_idx))].set(sent_embs)
    review_embs = attended_seq_embedding(rev_inp, jnp.asarray(reviewlens),
                                         params['review_emb'])        # [NR, emb]

    # ----- summaries -> bi-GRU final states, classifier + softmax fused
    summlens = np.array([len(s) for s in summaries], dtype=np.int32)
    T_sw = int(summlens.max())
    summ_ids = np.zeros((NR, T_sw), dtype=np.int32)
    for i, s in enumerate(summaries):
        summ_ids[i, :len(s)] = np.asarray(s, dtype=np.int32)
    summ_word_embs = params['summary_lookup'][jnp.asarray(summ_ids)]  # [NR,Tsw,Dw]
    return summary_classifier(summ_word_embs, jnp.asarray(summlens), review_embs,
                              params['summary_rnn'],
                              params['wcls_rev'], params['wcls_s'],
                              params['b_cls'])


if __name__ == "__main__":
    key = jax.random.PRNGKey(0)
    params = make_han_params(
        key, review_vocab=50, summary_vocab=40,
        word_emb_dim=32, rnn_hidden_dim=16, emb_dim=32, output_dim=3)

    # 2 reviews: review0 has 3 sentences, review1 has 2 sentences.
    reviews = [
        [[3, 7, 9, 2, 5], [4, 6, 8], [10, 11, 12, 13, 2, 3]],
        [[5, 2, 14, 7], [9, 3, 4, 6, 2, 8, 11]],
    ]
    summaries = [[2, 5, 7, 3], [4, 9, 8, 2, 6, 3]]

    out = han_forward(params, reviews, summaries)
    out = jax.block_until_ready(out)

    assert out.shape == (2, 3), out.shape
    assert bool(jnp.all(jnp.isfinite(out)))
    assert bool(jnp.allclose(jnp.sum(out, axis=1), 1.0, atol=1e-5))
    print("KERNEL_OK")
</pallas_src>

<mosaic_0001>
module attributes {stable_mosaic.version = 11 : i64} {
  func.func @_attended_kernel(%arg0: i32, %arg1: memref<1xi32, #tpu.memory_space<smem>>, %arg2: memref<1x128xi32, #tpu.memory_space<vmem>>, %arg3: memref<7x32x128xbf16, #tpu.memory_space<vmem>>, %arg4: memref<96x32xbf16, #tpu.memory_space<vmem>>, %arg5: memref<96x1xf32, #tpu.memory_space<vmem>>, %arg6: memref<96x32xf32, #tpu.memory_space<vmem>>, %arg7: memref<96x1xf32, #tpu.memory_space<vmem>>, %arg8: memref<32x32xf32, #tpu.memory_space<vmem>>, %arg9: memref<32x1xf32, #tpu.memory_space<vmem>>, %arg10: memref<32x1xf32, #tpu.memory_space<vmem>>, %arg11: memref<32x128xf32, #tpu.memory_space<vmem>>, %arg12: memref<7x96x128xf32, #tpu.memory_space<vmem>>, %arg13: memref<7x32x128xf32, #tpu.memory_space<vmem>>) attributes {dimension_semantics = [#tpu.dimension_semantics<parallel>], iteration_bounds = array<i64: 1>, scalar_prefetch = 1 : i64, scratch_operands = 2 : i64, tpu.core_type = #tpu.core_type<tc>, window_params = [{transform_indices = @transform_0, window_bounds = array<i64: 1, 128>}, {transform_indices = @transform_1, window_bounds = array<i64: 7, 32, 128>}, {pipeline_mode = #tpu.pipeline_mode<synchronous>, transform_indices = @transform_2, window_bounds = array<i64: 96, 32>}, {pipeline_mode = #tpu.pipeline_mode<synchronous>, transform_indices = @transform_3, window_bounds = array<i64: 96, 1>}, {pipeline_mode = #tpu.pipeline_mode<synchronous>, transform_indices = @transform_4, window_bounds = array<i64: 96, 32>}, {pipeline_mode = #tpu.pipeline_mode<synchronous>, transform_indices = @transform_5, window_bounds = array<i64: 96, 1>}, {pipeline_mode = #tpu.pipeline_mode<synchronous>, transform_indices = @transform_6, window_bounds = array<i64: 32, 32>}, {pipeline_mode = #tpu.pipeline_mode<synchronous>, transform_indices = @transform_7, window_bounds = array<i64: 32, 1>}, {pipeline_mode = #tpu.pipeline_mode<synchronous>, transform_indices = @transform_8, window_bounds = array<i64: 32, 1>}, {transform_indices = @transform_9, window_bounds = array<i64: 32, 128>}]} {
    %0 = arith.index_cast %arg0 : i32 to index
    %1 = memref.load %arg1[%0] : memref<1xi32, #tpu.memory_space<smem>>
    %c0 = arith.constant 0 : index
    %c0_0 = arith.constant 0 : index
    %2 = vector.load %arg2[%c0, %c0_0] : memref<1x128xi32, #tpu.memory_space<vmem>>, vector<1x128xi32>
    %c0_1 = arith.constant 0 : index
    %c0_2 = arith.constant 0 : index
    %3 = vector.load %arg4[%c0_1, %c0_2] : memref<96x32xbf16, #tpu.memory_space<vmem>>, vector<96x32xbf16>
    %c0_3 = arith.constant 0 : index
    %c0_4 = arith.constant 0 : index
    %4 = vector.load %arg5[%c0_3, %c0_4] : memref<96x1xf32, #tpu.memory_space<vmem>>, vector<96x1xf32>
    %c0_i32 = arith.constant 0 : i32
    %c0_i32_5 = arith.constant 0 : i32
    %5 = arith.subi %1, %c0_i32_5 : i32
    %6 = arith.addi %c0_i32_5, %5 : i32
    %c1_i32 = arith.constant 1 : i32
    scf.for %arg14 = %c0_i32_5 to %6 step %c1_i32  : i32 {
      %27 = arith.index_cast %arg14 : i32 to index
      %c0_26 = arith.constant 0 : index
      %c0_27 = arith.constant 0 : index
      %28 = vector.load %arg3[%27, %c0_26, %c0_27] : memref<7x32x128xbf16, #tpu.memory_space<vmem>>, vector<1x32x128xbf16>
      %29 = vector.shape_cast %28 : vector<1x32x128xbf16> to vector<32x128xbf16>
      %cst_28 = arith.constant dense<0.000000e+00> : vector<96x128xf32>
      %30 = tpu.matmul %3, %29, %cst_28 {dimension_numbers = #tpu.dot_dimension_numbers<[1], [0], [0], [1], [0, 0, 1, 1], [], []>} : vector<96x32xbf16>, vector<32x128xbf16>, vector<96x128xf32> -> vector<96x128xf32>
      %31 = vector.broadcast %4 : vector<96x1xf32> to vector<96x128xf32>
      %32 = arith.addf %30, %31 : vector<96x128xf32>
      %33 = vector.shape_cast %32 : vector<96x128xf32> to vector<1x96x128xf32>
      %34 = arith.index_cast %arg14 : i32 to index
      %c0_29 = arith.constant 0 : index
      %c0_30 = arith.constant 0 : index
      %35 = vector.load %arg12[%34, %c0_29, %c0_30] : memref<7x96x128xf32, #tpu.memory_space<vmem>>, vector<1x96x128xf32>
      tpu.vector_store %arg12[%34, %c0_29, %c0_30], %33 {strides = array<i32>} : memref<7x96x128xf32, #tpu.memory_space<vmem>>, vector<1x96x128xf32>,
    }
    %c0_6 = arith.constant 0 : index
    %c0_7 = arith.constant 0 : index
    %7 = vector.load %arg6[%c0_6, %c0_7] : memref<96x32xf32, #tpu.memory_space<vmem>>, vector<96x32xf32>
    %c0_8 = arith.constant 0 : index
    %c0_9 = arith.constant 0 : index
    %8 = vector.load %arg7[%c0_8, %c0_9] : memref<96x1xf32, #tpu.memory_space<vmem>>, vector<96x1xf32>
    %cst = arith.constant 0.000000e+00 : f32
    %9 = vector.broadcast %cst : f32 to vector<32x128xf32>
    %c0_i32_10 = arith.constant 0 : i32
    %10 = arith.subi %1, %c0_i32_10 : i32
    %11 = arith.addi %c0_i32_10, %10 : i32
    %c1_i32_11 = arith.constant 1 : i32
    %12 = scf.for %arg14 = %c0_i32_10 to %11 step %c1_i32_11 iter_args(%arg15 = %9) -> (vector<32x128xf32>)  : i32 {
      %c1_i32_26 = arith.constant 1 : i32
      %27 = arith.subi %1, %c1_i32_26 : i32
      %28 = arith.subi %27, %arg14 : i32
      %cst_27 = arith.constant dense<0.000000e+00> : vector<96x128xf32>
      %29 = tpu.matmul %7, %arg15, %cst_27 {dimension_numbers = #tpu.dot_dimension_numbers<[1], [0], [0], [1], [0, 0, 1, 1], [], []>} : vector<96x32xf32>, vector<32x128xf32>, vector<96x128xf32> -> vector<96x128xf32>
      %30 = vector.broadcast %8 : vector<96x1xf32> to vector<96x128xf32>
      %31 = arith.addf %29, %30 : vector<96x128xf32>
      %32 = arith.index_cast %arg14 : i32 to index
      %c0_28 = arith.constant 0 : index
      %c0_29 = arith.constant 0 : index
      %33 = vector.load %arg12[%32, %c0_28, %c0_29] : memref<7x96x128xf32, #tpu.memory_space<vmem>>, vector<1x48x128xf32>
      %34 = vector.shape_cast %33 : vector<1x48x128xf32> to vector<48x128xf32>
      %35 = arith.index_cast %28 : i32 to index
      %c48 = arith.constant 48 : index
      %c0_30 = arith.constant 0 : index
      %36 = vector.load %arg12[%35, %c48, %c0_30] : memref<7x96x128xf32, #tpu.memory_space<vmem>>, vector<1x48x128xf32>
      %37 = vector.shape_cast %36 : vector<1x48x128xf32> to vector<48x128xf32>
      %38 = vector.broadcast %arg14 : i32 to vector<1x128xi32>
      %39 = arith.cmpi slt, %38, %2 : vector<1x128xi32>
      %40 = vector.extract_strided_slice %31 {offsets = [0, 0], sizes = [48, 128], strides = [1, 1]} : vector<96x128xf32> to vector<48x128xf32>
      %41 = vector.extract_strided_slice %arg15 {offsets = [0, 0], sizes = [16, 128], strides = [1, 1]} : vector<32x128xf32> to vector<16x128xf32>
      %42 = vector.extract_strided_slice %34 {offsets = [0, 0], sizes = [16, 128], strides = [1, 1]} : vector<48x128xf32> to vector<16x128xf32>
      %43 = vector.extract_strided_slice %40 {offsets = [0, 0], sizes = [16, 128], strides = [1, 1]} : vector<48x128xf32> to vector<16x128xf32>
      %44 = arith.addf %42, %43 : vector<16x128xf32>
      %45 = arith.negf %44 : vector<16x128xf32>
      %46 = math.exp %45 : vector<16x128xf32>
      %cst_31 = arith.constant 1.000000e+00 : f32
      %47 = vector.broadcast %cst_31 : f32 to vector<16x128xf32>
      %48 = arith.addf %47, %46 : vector<16x128xf32>
      %49 = arith.divf %47, %48 : vector<16x128xf32>
      %50 = vector.extract_strided_slice %34 {offsets = [16, 0], sizes = [16, 128], strides = [1, 1]} : vector<48x128xf32> to vector<16x128xf32>
      %51 = vector.extract_strided_slice %40 {offsets = [16, 0], sizes = [16, 128], strides = [1, 1]} : vector<48x128xf32> to vector<16x128xf32>
      %52 = arith.addf %50, %51 : vector<16x128xf32>
      %53 = arith.negf %52 : vector<16x128xf32>
      %54 = math.exp %53 : vector<16x128xf32>
      %cst_32 = arith.constant 1.000000e+00 : f32
      %55 = vector.broadcast %cst_32 : f32 to vector<16x128xf32>
      %56 = arith.addf %55, %54 : vector<16x128xf32>
      %57 = arith.divf %55, %56 : vector<16x128xf32>
      %58 = vector.extract_strided_slice %34 {offsets = [32, 0], sizes = [16, 128], strides = [1, 1]} : vector<48x128xf32> to vector<16x128xf32>
      %59 = vector.extract_strided_slice %40 {offsets = [32, 0], sizes = [16, 128], strides = [1, 1]} : vector<48x128xf32> to vector<16x128xf32>
      %60 = arith.mulf %49, %59 : vector<16x128xf32>
      %61 = arith.addf %58, %60 : vector<16x128xf32>
      %62 = math.tanh %61 : vector<16x128xf32>
      %cst_33 = arith.constant 1.000000e+00 : f32
      %63 = vector.broadcast %cst_33 : f32 to vector<16x128xf32>
      %64 = arith.subf %63, %57 : vector<16x128xf32>
      %65 = arith.mulf %64, %62 : vector<16x128xf32>
      %66 = arith.mulf %57, %41 : vector<16x128xf32>
      %67 = arith.addf %65, %66 : vector<16x128xf32>
      %68 = vector.extract_strided_slice %arg15 {offsets = [0, 0], sizes = [16, 128], strides = [1, 1]} : vector<32x128xf32> to vector<16x128xf32>
      %69 = vector.shape_cast %39 : vector<1x128xi1> to vector<1x128xi1>
      %70 = vector.broadcast %69 : vector<1x128xi1> to vector<16x128xi1>
      %71 = arith.select %70, %67, %68 : vector<16x128xi1>, vector<16x128xf32>
      %72 = vector.broadcast %28 : i32 to vector<1x128xi32>
      %73 = arith.cmpi slt, %72, %2 : vector<1x128xi32>
      %74 = vector.extract_strided_slice %31 {offsets = [48, 0], sizes = [48, 128], strides = [1, 1]} : vector<96x128xf32> to vector<48x128xf32>
      %75 = vector.extract_strided_slice %arg15 {offsets = [16, 0], sizes = [16, 128], strides = [1, 1]} : vector<32x128xf32> to vector<16x128xf32>
      %76 = vector.extract_strided_slice %37 {offsets = [0, 0], sizes = [16, 128], strides = [1, 1]} : vector<48x128xf32> to vector<16x128xf32>
      %77 = vector.extract_strided_slice %74 {offsets = [0, 0], sizes = [16, 128], strides = [1, 1]} : vector<48x128xf32> to vector<16x128xf32>
      %78 = arith.addf %76, %77 : vector<16x128xf32>
      %79 = arith.negf %78 : vector<16x128xf32>
      %80 = math.exp %79 : vector<16x128xf32>
      %cst_34 = arith.constant 1.000000e+00 : f32
      %81 = vector.broadcast %cst_34 : f32 to vector<16x128xf32>
      %82 = arith.addf %81, %80 : vector<16x128xf32>
      %83 = arith.divf %81, %82 : vector<16x128xf32>
      %84 = vector.extract_strided_slice %37 {offsets = [16, 0], sizes = [16, 128], strides = [1, 1]} : vector<48x128xf32> to vector<16x128xf32>
      %85 = vector.extract_strided_slice %74 {offsets = [16, 0], sizes = [16, 128], strides = [1, 1]} : vector<48x128xf32> to vector<16x128xf32>
      %86 = arith.addf %84, %85 : vector<16x128xf32>
      %87 = arith.negf %86 : vector<16x128xf32>
      %88 = math.exp %87 : vector<16x128xf32>
      %cst_35 = arith.constant 1.000000e+00 : f32
      %89 = vector.broadcast %cst_35 : f32 to vector<16x128xf32>
      %90 = arith.addf %89, %88 : vector<16x128xf32>
      %91 = arith.divf %89, %90 : vector<16x128xf32>
      %92 = vector.extract_strided_slice %37 {offsets = [32, 0], sizes = [16, 128], strides = [1, 1]} : vector<48x128xf32> to vector<16x128xf32>
      %93 = vector.extract_strided_slice %74 {offsets = [32, 0], sizes = [16, 128], strides = [1, 1]} : vector<48x128xf32> to vector<16x128xf32>
      %94 = arith.mulf %83, %93 : vector<16x128xf32>
      %95 = arith.addf %92, %94 : vector<16x128xf32>
      %96 = math.tanh %95 : vector<16x128xf32>
      %cst_36 = arith.constant 1.000000e+00 : f32
      %97 = vector.broadcast %cst_36 : f32 to vector<16x128xf32>
      %98 = arith.subf %97, %91 : vector<16x128xf32>
      %99 = arith.mulf %98, %96 : vector<16x128xf32>
      %100 = arith.mulf %91, %75 : vector<16x128xf32>
      %101 = arith.addf %99, %100 : vector<16x128xf32>
      %102 = vector.extract_strided_slice %arg15 {offsets = [16, 0], sizes = [16, 128], strides = [1, 1]} : vector<32x128xf32> to vector<16x128xf32>
      %103 = vector.shape_cast %73 : vector<1x128xi1> to vector<1x128xi1>
      %104 = vector.broadcast %103 : vector<1x128xi1> to vector<16x128xi1>
      %105 = arith.select %104, %101, %102 : vector<16x128xi1>, vector<16x128xf32>
      %106 = vector.shape_cast %71 : vector<16x128xf32> to vector<1x16x128xf32>
      %107 = arith.index_cast %arg14 : i32 to index
      %c0_37 = arith.constant 0 : index
      %c0_38 = arith.constant 0 : index
      %108 = vector.load %arg13[%107, %c0_37, %c0_38] : memref<7x32x128xf32, #tpu.memory_space<vmem>>, vector<1x16x128xf32>
      tpu.vector_store %arg13[%107, %c0_37, %c0_38], %106 {strides = array<i32>} : memref<7x32x128xf32, #tpu.memory_space<vmem>>, vector<1x16x128xf32>,
      %109 = vector.shape_cast %105 : vector<16x128xf32> to vector<1x16x128xf32>
      %110 = arith.index_cast %28 : i32 to index
      %c16 = arith.constant 16 : index
      %c0_39 = arith.constant 0 : index
      %111 = vector.load %arg13[%110, %c16, %c0_39] : memref<7x32x128xf32, #tpu.memory_space<vmem>>, vector<1x16x128xf32>
      tpu.vector_store %arg13[%110, %c16, %c0_39], %109 {strides = array<i32>} : memref<7x32x128xf32, #tpu.memory_space<vmem>>, vector<1x16x128xf32>,
      %112 = tpu.concatenate %71, %105 in 0 : vector<16x128xf32>, vector<16x128xf32> -> vector<32x128xf32>
      scf.yield %112 : vector<32x128xf32>
    }
    %c0_12 = arith.constant 0 : index
    %c0_13 = arith.constant 0 : index
    %13 = vector.load %arg8[%c0_12, %c0_13] : memref<32x32xf32, #tpu.memory_space<vmem>>, vector<32x32xf32>
    %c0_14 = arith.constant 0 : index
    %c0_15 = arith.constant 0 : index
    %14 = vector.load %arg9[%c0_14, %c0_15] : memref<32x1xf32, #tpu.memory_space<vmem>>, vector<32x1xf32>
    %c0_16 = arith.constant 0 : index
    %c0_17 = arith.constant 0 : index
    %15 = vector.load %arg10[%c0_16, %c0_17] : memref<32x1xf32, #tpu.memory_space<vmem>>, vector<32x1xf32>
    %cst_18 = arith.constant -1.000000e+30 : f32
    %16 = vector.broadcast %cst_18 : f32 to vector<1x128xf32>
    %cst_19 = arith.constant 0.000000e+00 : f32
    %17 = vector.broadcast %cst_19 : f32 to vector<1x128xf32>
    %cst_20 = arith.constant 0.000000e+00 : f32
    %18 = vector.broadcast %cst_20 : f32 to vector<32x128xf32>
    %c0_i32_21 = arith.constant 0 : i32
    %19 = arith.subi %1, %c0_i32_21 : i32
    %20 = arith.addi %c0_i32_21, %19 : i32
    %c1_i32_22 = arith.constant 1 : i32
    %21:3 = scf.for %arg14 = %c0_i32_21 to %20 step %c1_i32_22 iter_args(%arg15 = %16, %arg16 = %17, %arg17 = %18) -> (vector<1x128xf32>, vector<1x128xf32>, vector<32x128xf32>)  : i32 {
      %27 = arith.index_cast %arg14 : i32 to index
      %c0_26 = arith.constant 0 : index
      %c0_27 = arith.constant 0 : index
      %28 = vector.load %arg13[%27, %c0_26, %c0_27] : memref<7x32x128xf32, #tpu.memory_space<vmem>>, vector<1x32x128xf32>
      %29 = vector.shape_cast %28 : vector<1x32x128xf32> to vector<32x128xf32>
      %cst_28 = arith.constant dense<0.000000e+00> : vector<32x128xf32>
      %30 = tpu.matmul %13, %29, %cst_28 {dimension_numbers = #tpu.dot_dimension_numbers<[1], [0], [0], [1], [0, 0, 1, 1], [], []>} : vector<32x32xf32>, vector<32x128xf32>, vector<32x128xf32> -> vector<32x128xf32>
      %31 = vector.broadcast %14 : vector<32x1xf32> to vector<32x128xf32>
      %32 = arith.addf %30, %31 : vector<32x128xf32>
      %33 = math.tanh %32 : vector<32x128xf32>
      %34 = vector.broadcast %15 : vector<32x1xf32> to vector<32x128xf32>
      %35 = arith.mulf %33, %34 : vector<32x128xf32>
      %cst_29 = arith.constant dense<0.000000e+00> : vector<128xf32>
      %36 = vector.multi_reduction <add>, %35, %cst_29 [0] : vector<32x128xf32> to vector<128xf32>
      %37 = vector.shape_cast %36 : vector<128xf32> to vector<1x128xf32>
      %38 = vector.broadcast %arg14 : i32 to vector<1x128xi32>
      %39 = arith.cmpi slt, %38, %2 : vector<1x128xi32>
      %cst_30 = arith.constant -1.000000e+30 : f32
      %40 = vector.broadcast %cst_30 : f32 to vector<1x128xf32>
      %41 = arith.select %39, %37, %40 : vector<1x128xi1>, vector<1x128xf32>
      %42 = arith.maximumf %arg15, %41 : vector<1x128xf32>
      %43 = arith.subf %arg15, %42 : vector<1x128xf32>
      %44 = math.exp %43 : vector<1x128xf32>
      %45 = arith.subf %41, %42 : vector<1x128xf32>
      %46 = math.exp %45 : vector<1x128xf32>
      %cst_31 = arith.constant 0.000000e+00 : f32
      %47 = vector.broadcast %cst_31 : f32 to vector<1x128xf32>
      %48 = arith.select %39, %46, %47 : vector<1x128xi1>, vector<1x128xf32>
      %49 = arith.mulf %44, %arg16 : vector<1x128xf32>
      %50 = arith.addf %49, %48 : vector<1x128xf32>
      %51 = vector.broadcast %44 : vector<1x128xf32> to vector<32x128xf32>
      %52 = arith.mulf %51, %arg17 : vector<32x128xf32>
      %53 = vector.broadcast %48 : vector<1x128xf32> to vector<32x128xf32>
      %54 = arith.mulf %53, %29 : vector<32x128xf32>
      %55 = arith.addf %52, %54 : vector<32x128xf32>
      scf.yield %42, %50, %55 : vector<1x128xf32>, vector<1x128xf32>, vector<32x128xf32>
    }
    %cst_23 = arith.constant 9.99999968E-21 : f32
    %22 = vector.broadcast %cst_23 : f32 to vector<1x128xf32>
    %23 = arith.maximumf %21#1, %22 : vector<1x128xf32>
    %24 = vector.broadcast %23 : vector<1x128xf32> to vector<32x128xf32>
    %25 = arith.divf %21#2, %24 : vector<32x128xf32>
    %c0_24 = arith.constant 0 : index
    %c0_25 = arith.constant 0 : index
    %26 = vector.load %arg11[%c0_24, %c0_25] : memref<32x128xf32, #tpu.memory_space<vmem>>, vector<32x128xf32>
    tpu.vector_store %arg11[%c0_24, %c0_25], %25 {strides = array<i32>} : memref<32x128xf32, #tpu.memory_space<vmem>>, vector<32x128xf32>,
    return
  }
  func.func @transform_0(%arg0: i32, %arg1: memref<1xi32, #tpu.memory_space<smem>>) -> (i32, i32) {
    %c0_i32 = arith.constant 0 : i32
    %c0_i32_0 = arith.constant 0 : i32
    return %c0_i32, %arg0 : i32, i32
  }
  func.func @transform_1(%arg0: i32, %arg1: memref<1xi32, #tpu.memory_space<smem>>) -> (i32, i32, i32) {
    %c0_i32 = arith.constant 0 : i32
    %c0_i32_0 = arith.constant 0 : i32
    %c0_i32_1 = arith.constant 0 : i32
    return %c0_i32, %c0_i32_0, %arg0 : i32, i32, i32
  }
  func.func @transform_2(%arg0: i32, %arg1: memref<1xi32, #tpu.memory_space<smem>>) -> (i32, i32) {
    %c0_i32 = arith.constant 0 : i32
    %c0_i32_0 = arith.constant 0 : i32
    %c0_i32_1 = arith.constant 0 : i32
    return %c0_i32, %c0_i32_0 : i32, i32
  }
  func.func @transform_3(%arg0: i32, %arg1: memref<1xi32, #tpu.memory_space<smem>>) -> (i32, i32) {
    %c0_i32 = arith.constant 0 : i32
    %c0_i32_0 = arith.constant 0 : i32
    %c0_i32_1 = arith.constant 0 : i32
    return %c0_i32, %c0_i32_0 : i32, i32
  }
  func.func @transform_4(%arg0: i32, %arg1: memref<1xi32, #tpu.memory_space<smem>>) -> (i32, i32) {
    %c0_i32 = arith.constant 0 : i32
    %c0_i32_0 = arith.constant 0 : i32
    %c0_i32_1 = arith.constant 0 : i32
    return %c0_i32, %c0_i32_0 : i32, i32
  }
  func.func @transform_5(%arg0: i32, %arg1: memref<1xi32, #tpu.memory_space<smem>>) -> (i32, i32) {
    %c0_i32 = arith.constant 0 : i32
    %c0_i32_0 = arith.constant 0 : i32
    %c0_i32_1 = arith.constant 0 : i32
    return %c0_i32, %c0_i32_0 : i32, i32
  }
  func.func @transform_6(%arg0: i32, %arg1: memref<1xi32, #tpu.memory_space<smem>>) -> (i32, i32) {
    %c0_i32 = arith.constant 0 : i32
    %c0_i32_0 = arith.constant 0 : i32
    %c0_i32_1 = arith.constant 0 : i32
    return %c0_i32, %c0_i32_0 : i32, i32
  }
  func.func @transform_7(%arg0: i32, %arg1: memref<1xi32, #tpu.memory_space<smem>>) -> (i32, i32) {
    %c0_i32 = arith.constant 0 : i32
    %c0_i32_0 = arith.constant 0 : i32
    %c0_i32_1 = arith.constant 0 : i32
    return %c0_i32, %c0_i32_0 : i32, i32
  }
  func.func @transform_8(%arg0: i32, %arg1: memref<1xi32, #tpu.memory_space<smem>>) -> (i32, i32) {
    %c0_i32 = arith.constant 0 : i32
    %c0_i32_0 = arith.constant 0 : i32
    %c0_i32_1 = arith.constant 0 : i32
    return %c0_i32, %c0_i32_0 : i32, i32
  }
  func.func @transform_9(%arg0: i32, %arg1: memref<1xi32, #tpu.memory_space<smem>>) -> (i32, i32) {
    %c0_i32 = arith.constant 0 : i32
    %c0_i32_0 = arith.constant 0 : i32
    return %c0_i32, %arg0 : i32, i32
  }
}

</mosaic_0001>

<bundles_post_ra>
// kernel: tpu_custom_call.1
= control target key start
LH: loop header
LB: loop body
LE: loop exit
PB: predicated region body
PF: predicated region fallthrough
CT: control target
= control target key end

     0   :  { %16 = vsyncpa [#allocation7], 0  ;;  %s2243_s0 = inlined_call_operand.<no memory space> [shape: s32[1], index: 0, kind: input, shape index: {}]   ;;  %s2244_s1 = inlined_call_operand.vmem [shape: s32[1,128], index: 1, kind: input, shape index: {}]   ;;  %s2245_s2 = inlined_call_operand.vmem [shape: bf16[7,32,128], index: 2, kind: input, shape index: {}]   ;;  %s2246_s3 = inlined_call_operand.vmem [shape: bf16[96,32], index: 3, kind: input, shape index: {}]   ;;  %s2247_s4 = inlined_call_operand.vmem [shape: f32[96,1], index: 4, kind: input, shape index: {}]   ;;  %s2248_s5 = inlined_call_operand.vmem [shape: f32[96,32], index: 5, kind: input, shape index: {}]   ;;  %s2249_s6 = inlined_call_operand.vmem [shape: f32[96,1], index: 6, kind: input, shape index: {}]   ;;  %s2250_s7 = inlined_call_operand.vmem [shape: f32[32,32], index: 7, kind: input, shape index: {}]   ;;  %s2251_s8 = inlined_call_operand.vmem [shape: f32[32,1], index: 8, kind: input, shape index: {}]   ;;  %s2252_s9 = inlined_call_operand.vmem [shape: f32[32,1], index: 9, kind: input, shape index: {}]   ;;  %s2253_s10 = inlined_call_operand.hbm [shape: f32[32,128], index: 10, kind: output, shape index: {}]  }
   0x1   :  { %v1588_v0 = vld [vmem:[%s2244_s1] sm:$0x1]  ;;  %v1598_v2 = vld [vmem:[%s2246_s3 + $0x4] sm:$0xf]  ;;  %v1603_v3 = vld [vmem:[%s2246_s3 + $0x8] sm:$0xf] }
   0x2   :  { %v1593_v1 = vld [vmem:[%s2246_s3] sm:$0xf]  ;;  %v1608_v4 = vld [vmem:[%s2246_s3 + $0xc] sm:$0xf]  ;;  %v1613_v5 = vld [vmem:[%s2246_s3 + $0x10] sm:$0xf] }
   0x3   :  { %v1618_v6 = vld [vmem:[%s2246_s3 + $0x14] sm:$0xf]  ;;  %v1623_v7 = vld [vmem:[%s2246_s3 + $0x18] sm:$0xf]  ;;  %v1628_v8 = vld [vmem:[%s2246_s3 + $0x1c] sm:$0xf] }
   0x4   :  { %v1633_v9 = vld [vmem:[%s2246_s3 + $0x20] sm:$0xf]  ;;  %v1638_v10 = vld [vmem:[%s2246_s3 + $0x24] sm:$0xf]  ;;  %v1643_v11 = vld [vmem:[%s2246_s3 + $0x28] sm:$0xf] }
   0x5   :  { %v1648_v12 = vld [vmem:[%s2246_s3 + $0x2c] sm:$0xf]  ;;  %v1653_v13 = vld [vmem:[%s2247_s4] sm:$0xff]  ;;  %v1663_v15 = vld [vmem:[%s2247_s4 + $0x10] sm:$0xff]  ;;  %p990_p0 = scmp.le.s32.totalorder %s2243_s0, 0 }
   0x6   :  { %v1658_v14 = vld [vmem:[%s2247_s4 + $0x8] sm:$0xff]  ;;  %v1668_v16 = vld [vmem:[%s2247_s4 + $0x18] sm:$0xff]  ;;  %v1673_v17 = vld [vmem:[%s2247_s4 + $0x20] sm:$0xff]  ;;  %s1717_s23 = smov (!%p990_p0), 0  }
   0x7   :  { %v1678_v18 = vld [vmem:[%s2247_s4 + $0x28] sm:$0xff]  ;;  %v1683_v19 = vld [vmem:[%s2247_s4 + $0x30] sm:$0xff]  ;;  %v1688_v20 = vld [vmem:[%s2247_s4 + $0x38] sm:$0xff]  ;;  %947 = sbr.rel (%p990_p0) target bundleno = 234 (0xea), region = 78 }
   0x8   :  { %v1693_v21 = vld [vmem:[%s2247_s4 + $0x40] sm:$0xff]  ;;  %v1698_v22 = vld [vmem:[%s2247_s4 + $0x48] sm:$0xff]  ;;  %v1703_v23 = vld [vmem:[%s2247_s4 + $0x50] sm:$0xff] }
   0x9   :  { %v1708_v24 = vld [vmem:[%s2247_s4 + $0x58] sm:$0xff] }
   0xc LB: > { %v993_v25 = vcombine.low %v1593_v1, %v1598_v2  ;;  %vm177_vm0 = vcmask 261120   ;;  %v995_v26 = vcombine.low %v1613_v5, %v1618_v6  ;;  %s1037_s4 = sshll.u32 %s1454_s23, 4  ;;  %v1524_v27 = vmov 0   ;;  %s277_s26 = smul.u32 96, %s1454_s23  ;;  %s1454_s23 = sphi %s1717_s23, %s65_s23  }
   0xd   : > { %s70_s25 = scalar_lea.vmem %s2245_s2, %s1037_s4  ;;  %1297 = vset.pattern.permute.xlu1 %v1524_v27  ;;  %1296 = vset.pattern.permute.xlu0 %v1524_v27  ;;  %v994_v30 = vcombine.low %v1603_v3, %v1608_v4  ;;  %v996_v31 = vcombine.low %v1623_v7, %v1628_v8  ;;  %v997_v32 = vcombine.low %v1633_v9, %v1638_v10  ;;  %s65_s23 = sadd.s32 1, %s1454_s23  }
   0xe   : > { %1074 = vmatprep.mubr.msk.bf16.mxu0 %vm177_vm0, %v993_v25  ;;  %1078 = vmatprep.mubr.msk.bf16.mxu1 %vm177_vm0, %v995_v26  ;;  %v1298_v28 = vld [vmem:[%s70_s25 + $0x8] sm:$0xff]   ;;  %v1299_v29 = vld [vmem:[%s70_s25] sm:$0xff]   ;;  %v998_v33 = vcombine.low %v1643_v11, %v1648_v12  ;;  %s1757_s27 = scalar_lea.vmem [#allocation2], %s277_s26  ;;  %p64_p1 = scmp.ge.s32.totalorder %s65_s23, %s2243_s0 }
   0xf   : > { %87 = vperm.xlu1 %1297, %v1663_v15   ;;  %77 = vperm.xlu0 %1296, %v1653_v13  }
  0x10   : > { %1070 = vmatprep.subr.bf16.mxu0 %v1298_v28  ;;  %1126 = vmatprep.subr.bf16.mxu1 %v1298_v28 }
  0x11   : > { %1071 = vmatpush3.bf16.msra.mxu0 %v1298_v28  ;;  %1128 = vmatpush3.bf16.msra.mxu1 %v1298_v28 }
  0x12   : > { %1072 = vmatprep.subr.bf16.mxu0 %v1299_v29  ;;  %1127 = vmatprep.subr.bf16.mxu1 %v1299_v29 }
  0x13   : > { %92 = vperm.xlu1 %1297, %v1668_v16   ;;  %82 = vperm.xlu0 %1296, %v1658_v14  }
  0x15   : > { %1073 = vmatpush3.bf16.msra.mxu0 %v1299_v29  ;;  %1129 = vmatpush3.bf16.msra.mxu1 %v1299_v29 }
  0x17   : > { %102 = vperm.xlu1 %1297, %v1678_v18   ;;  %97 = vperm.xlu0 %1296, %v1673_v17  }
  0x18   : > { %1075 = vmatmul.mubr.msk.bf16.vlgmr.msra.gmra.mxu0 %vm177_vm0, %v994_v30  ;;  %1079 = vmatmul.mubr.msk.bf16.vlgmr.msra.gmra.mxu1 %vm177_vm0, %v996_v31 }
  0x19   : > { %1082 = vmatprep.mubr.msk.bf16.mxu1 %vm177_vm0, %v997_v32 }
  0x1b   : > { %112 = vperm.xlu1 %1297, %v1688_v20   ;;  %107 = vperm.xlu0 %1296, %v1683_v19  }
  0x1f   : > { %122 = vperm.xlu1 %1297, %v1698_v22   ;;  %117 = vperm.xlu0 %1296, %v1693_v21  }
  0x20   : > { %1083 = vmatmul.mubr.msk.bf16.gmra.mxu1 %vm177_vm0, %v998_v33 }
  0x23   : > { %132 = vperm.xlu1 %1297, %v1708_v24   ;;  %127 = vperm.xlu0 %1296, %v1703_v23  }
  0x8a   : > { %v78_v34 = vpop.permute.xlu0 %77  ;;  %v88_v35 = vpop.permute.xlu1 %87 }
  0x8e   : > { %v83_v36 = vpop.permute.xlu0 %82  ;;  %v93_v37 = vpop.permute.xlu1 %92 }
  0x92   : > { %v98_v38 = vpop.permute.xlu0 %97  ;;  %v103_v39 = vpop.permute.xlu1 %102 }
  0x96   : > { %v108_v40 = vpop.permute.xlu0 %107  ;;  %v113_v41 = vpop.permute.xlu1 %112 }
  0x9a   : > { %v118_v44 = vpop.permute.xlu0 %117  ;;  %v123_v53 = vpop.permute.xlu1 %122 }
  0x9e   : > { %v128_v60 = vpop.permute.xlu0 %127  ;;  %v133_v26 = vpop.permute.xlu1 %132 }
  0xd8   : > { %v1076_v42 = vpop.f32.mrf.mxu0  ;;  %v1080_v43 = vpop.f32.mrf.mxu1 }
  0xd9   : > { %v239_v45 = vadd.f32 %v1076_v42, %v88_v35  ;;  %v255_v46 = vadd.f32 %v1080_v43, %v108_v40 }
  0xda   : > { %v230_v47 = vpop.f32.mrf.mxu0  ;;  %v246_v48 = vpop.f32.mrf.mxu1 }
  0xdb   : > { %281 = vst [vmem:[%s1757_s27 + $0x10] sm:$0xff] %v239_v45  ;;  %285 = vst [vmem:[%s1757_s27 + $0x30] sm:$0xff] %v255_v46  ;;  %v231_v49 = vadd.f32 %v230_v47, %v78_v34  ;;  %v247_v50 = vadd.f32 %v246_v48, %v98_v38 }
  0xdc   : > { %v1077_v51 = vpop.f32.mrf.mxu0  ;;  %v1081_v52 = vpop.f32.mrf.mxu1 }
  0xdd   : > { %279 = vst [vmem:[%s1757_s27] sm:$0xff] %v231_v49  ;;  %283 = vst [vmem:[%s1757_s27 + $0x20] sm:$0xff] %v247_v50  ;;  %v242_v54 = vadd.f32 %v1077_v51, %v93_v37  ;;  %v258_v55 = vadd.f32 %v1081_v52, %v113_v41 }
  0xde   : > { %v233_v56 = vpop.f32.mrf.mxu0  ;;  %v249_v57 = vpop.f32.mrf.mxu1 }
  0xdf   : > { %282 = vst [vmem:[%s1757_s27 + $0x18] sm:$0xff] %v242_v54  ;;  %286 = vst [vmem:[%s1757_s27 + $0x38] sm:$0xff] %v258_v55  ;;  %v234_v58 = vadd.f32 %v233_v56, %v83_v36  ;;  %v250_v59 = vadd.f32 %v249_v57, %v103_v39 }
  0xe0   : > { %v1084_v61 = vpop.f32.mrf.mxu1 }
  0xe1   : > { %280 = vst [vmem:[%s1757_s27 + $0x8] sm:$0xff] %v234_v58  ;;  %284 = vst [vmem:[%s1757_s27 + $0x28] sm:$0xff] %v250_v59  ;;  %v271_v62 = vadd.f32 %v1084_v61, %v128_v60 }
  0xe2   : > { %v262_v63 = vpop.f32.mrf.mxu1 }
  0xe3   : > { %289 = vst [vmem:[%s1757_s27 + $0x50] sm:$0xff] %v271_v62  ;;  %v263_v25 = vadd.f32 %v262_v63, %v118_v44 }
  0xe4   : > { %v1085_v27 = vpop.f32.mrf.mxu1 }
  0xe5   : > { %287 = vst [vmem:[%s1757_s27 + $0x40] sm:$0xff] %v263_v25  ;;  %v274_v28 = vadd.f32 %v1085_v27, %v133_v26  ;;  %67 = sbr.rel (!%p64_p1) target bundleno = 12 (0xc), region = 84 }
  0xe6   : > { %v265_v29 = vpop.f32.mrf.mxu1 }
  0xe7   : > { %290 = vst [vmem:[%s1757_s27 + $0x58] sm:$0xff] %v274_v28  ;;  %v266_v30 = vadd.f32 %v265_v29, %v123_v53 }
  0xe9   : > { %288 = vst [vmem:[%s1757_s27 + $0x48] sm:$0xff] %v266_v30 }
  0xea PF:  { %v1780_v31 = vld [vmem:[%s2248_s5] sm:$0xff]  ;;  %v1785_v32 = vld [vmem:[%s2248_s5 + $0x8] sm:$0xff]  ;;  %v1790_v33 = vld [vmem:[%s2248_s5 + $0x10] sm:$0xff]  ;;  %s1909_s11 = smov (!%p990_p0), 0  }
  0xeb   :  { %v1795_v34 = vld [vmem:[%s2248_s5 + $0x18] sm:$0xff]  ;;  %v1800_v1 = vld [vmem:[%s2248_s5 + $0x20] sm:$0xff]  ;;  %v1805_v2 = vld [vmem:[%s2248_s5 + $0x28] sm:$0xff] }
  0xec   :  { %v1810_v3 = vld [vmem:[%s2248_s5 + $0x30] sm:$0xff]  ;;  %v1815_v4 = vld [vmem:[%s2248_s5 + $0x38] sm:$0xff]  ;;  %v1820_v5 = vld [vmem:[%s2248_s5 + $0x40] sm:$0xff] }
  0xed   :  { %v1825_v6 = vld [vmem:[%s2248_s5 + $0x48] sm:$0xff]  ;;  %v1830_v7 = vld [vmem:[%s2248_s5 + $0x50] sm:$0xff]  ;;  %v1835_v8 = vld [vmem:[%s2248_s5 + $0x58] sm:$0xff]  ;;  %956 = sbr.rel (%p990_p0) target bundleno = 508 (0x1fc), region = 89 }
  0xee   :  { %v1840_v9 = vld [vmem:[%s2249_s6] sm:$0xff]  ;;  %v1845_v10 = vld [vmem:[%s2249_s6 + $0x8] sm:$0xff]  ;;  %v1850_v11 = vld [vmem:[%s2249_s6 + $0x10] sm:$0xff] }
  0xef   :  { %v1855_v12 = vld [vmem:[%s2249_s6 + $0x18] sm:$0xff]  ;;  %v1860_v13 = vld [vmem:[%s2249_s6 + $0x20] sm:$0xff]  ;;  %v1865_v14 = vld [vmem:[%s2249_s6 + $0x28] sm:$0xff] }
  0xf0   :  { %v1870_v15 = vld [vmem:[%s2249_s6 + $0x30] sm:$0xff]  ;;  %v1875_v16 = vld [vmem:[%s2249_s6 + $0x38] sm:$0xff]  ;;  %v1880_v17 = vld [vmem:[%s2249_s6 + $0x40] sm:$0xff] }
  0xf1   :  { %v1885_v18 = vld [vmem:[%s2249_s6 + $0x48] sm:$0xff]  ;;  %v1890_v19 = vld [vmem:[%s2249_s6 + $0x50] sm:$0xff]  ;;  %v1895_v20 = vld [vmem:[%s2249_s6 + $0x58] sm:$0xff] }
  0xf2   :  { %v1901_v21 = vmov 0.0   ;;  %v1903_v22 = vmov 0.0   ;;  %v1905_v23 = vmov 0.0   ;;  %v1907_v24 = vmov 0.0  }
  0xf3 LB: > { %1086 = vmatprep.subr.mxu0 %v1458_v21  ;;  %1130 = vmatprep.subr.mxu1 %v1458_v21  ;;  %vm387_vm1 = vcmask 261120   ;;  %v1525_v35 = vmov 0   ;;  %s1008_s13 = sadd.s32 4294967295, %s2243_s0  ;;  %s549_s15 = smul.u32 96, %s1474_s11  ;;  %s1474_s11 = sphi %s1909_s11, %s318_s11   ;;  %v1470_v24 = vphi %v1907_v24, %v615_v24   ;;  %v1466_v23 = vphi %v1905_v23, %v616_v23   ;;  %v1462_v22 = vphi %v1903_v22, %v667_v22   ;;  %v1458_v21 = vphi %v1901_v21, %v668_v21  }
  0xf4   : > { %1087 = vmatpush3.msra.mxu0 %v1458_v21  ;;  %1134 = vmatpush3.msra.mxu1 %v1458_v21  ;;  %s1984_s14 = ssub.s32 %s1008_s13, %s1474_s11  ;;  %s1029_s2 = sshll.u32 %s1474_s11, 5 }
  0xf5   : > { %1088 = vmatprep.subr.mxu0 %v1462_v22  ;;  %1131 = vmatprep.subr.mxu1 %v1462_v22  ;;  %s557_s16 = smul.u32 96, %s1984_s14  ;;  %s1988_s17 = scalar_lea.vmem [#allocation2], %s549_s15 }
  0xf6   : > { %1089 = vmatpush3.msra.mxu0 %v1462_v22  ;;  %1135 = vmatpush3.msra.mxu1 %v1462_v22  ;;  %v552_v42 = vld [vmem:[%s1988_s17 + $0x8] sm:$0xff]  ;;  %v551_v49 = vld [vmem:[%s1988_s17] sm:$0xff]  ;;  %v554_v25 = vld [vmem:[%s1988_s17 + $0x18] sm:$0xff]  ;;  %s1030_s18 = sshll.u32 %s1984_s14, 5  ;;  %s670_s19 = scalar_lea.vmem [#allocation3], %s1029_s2 }
  0xf7   : > { %1090 = vmatprep.subr.mxu0 %v1466_v23  ;;  %1132 = vmatprep.subr.mxu1 %v1466_v23  ;;  %s1991_s5 = scalar_lea.vmem [#allocation2], %s557_s16  ;;  %s674_s20 = scalar_lea.vmem [#allocation3], %s1030_s18 }
  0xf8   : > { %1091 = vmatpush3.msra.mxu0 %v1466_v23  ;;  %1136 = vmatpush3.msra.mxu1 %v1466_v23  ;;  %v560_v44 = vld [vmem:[%s1991_s5 + $0x38] sm:$0xff]  ;;  %v559_v51 = vld [vmem:[%s1991_s5 + $0x30] sm:$0xff] }
  0xf9   : > { %1092 = vmatprep.subr.mxu0 %v1470_v24  ;;  %1133 = vmatprep.subr.mxu1 %v1470_v24 }
  0xfa   : > { %1093 = vmatpush3.msra.mxu0 %v1470_v24  ;;  %1137 = vmatpush3.msra.mxu1 %v1470_v24 }
  0xfb   : > { %1094 = vmatprep.mubr.msk.f32.mxu0 %vm387_vm1, %v1780_v31  ;;  %1103 = vmatprep.mubr.msk.f32.mxu1 %vm387_vm1, %v1810_v3 }
  0xfc   : > { %1095 = vmatmul.mubr.msk.f32.vlgmr.msra.gmra.mxu0 %vm387_vm1, %v1785_v32  ;;  %1104 = vmatmul.mubr.msk.f32.vlgmr.msra.gmra.mxu1 %vm387_vm1, %v1815_v4 }
  0xfd   : > { %1097 = vmatprep.mubr.msk.f32.mxu0 %vm387_vm1, %v1790_v33  ;;  %1106 = vmatprep.mubr.msk.f32.mxu1 %vm387_vm1, %v1820_v5 }
  0xfe   : > { %1300 = vset.pattern.permute.xlu0 %v1525_v35  ;;  %1301 = vset.pattern.permute.xlu1 %v1525_v35 }
  0xff   : > { %329 = vperm.xlu0 %1300, %v1840_v9   ;;  %359 = vperm.xlu1 %1301, %v1870_v15  }
 0x100   : > { %1098 = vmatmul.mubr.msk.f32.gmra.mxu0 %vm387_vm1, %v1795_v34  ;;  %1107 = vmatmul.mubr.msk.f32.gmra.mxu1 %vm387_vm1, %v1825_v6 }
 0x101   : > { %1100 = vmatprep.mubr.msk.f32.mxu0 %vm387_vm1, %v1800_v1  ;;  %1109 = vmatprep.mubr.msk.f32.mxu1 %vm387_vm1, %v1830_v7 }
 0x103   : > { %334 = vperm.xlu0 %1300, %v1845_v10   ;;  %364 = vperm.xlu1 %1301, %v1875_v16  }
 0x104   : > { %1101 = vmatmul.mubr.msk.f32.gmra.mxu0 %vm387_vm1, %v1805_v2  ;;  %1110 = vmatmul.mubr.msk.f32.gmra.mxu1 %vm387_vm1, %v1835_v8 }
 0x107   : > { %339 = vperm.xlu0 %1300, %v1850_v11   ;;  %344 = vperm.xlu1 %1301, %v1855_v12  }
 0x10b   : > { %369 = vperm.xlu0 %1300, %v1880_v17   ;;  %374 = vperm.xlu1 %1301, %v1885_v18  }
 0x10f   : > { %349 = vperm.xlu0 %1300, %v1860_v13   ;;  %354 = vperm.xlu1 %1301, %v1865_v14  }
 0x113   : > { %379 = vperm.xlu0 %1300, %v1890_v19   ;;  %384 = vperm.xlu1 %1301, %v1895_v20  }
 0x17a   : > { %v360_v36 = vpop.permute.xlu1 %359  ;;  %v330_v37 = vpop.permute.xlu0 %329 }
 0x17e   : > { %v365_v38 = vpop.permute.xlu1 %364  ;;  %v335_v39 = vpop.permute.xlu0 %334 }
 0x182   : > { %v345_v40 = vpop.permute.xlu1 %344  ;;  %v340_v45 = vpop.permute.xlu0 %339 }
 0x186   : > { %v375_v58 = vpop.permute.xlu1 %374  ;;  %v370_v29 = vpop.permute.xlu0 %369 }
 0x1bc   : > { %v1096_v41 = vpop.f32.mrf.mxu0  ;;  %v1105_v43 = vpop.f32.mrf.mxu1 }
 0x1bd   : > { %v496_v46 = vadd.f32 %v1096_v41, %v335_v39  ;;  %v526_v47 = vadd.f32 %v1105_v43, %v365_v38  ;;  %v553_v39 = vld [vmem:[%s1988_s17 + $0x10] sm:$0xff]  ;;  %v561_v43 = vld [vmem:[%s1991_s5 + $0x40] sm:$0xff] }
 0x1be   : > { %v490_v48 = vpop.f32.mrf.mxu0  ;;  %v520_v50 = vpop.f32.mrf.mxu1 }
 0x1bf   : > { %v568_v52 = vadd.f32 %v552_v42, %v496_v46  ;;  %v620_v53 = vadd.f32 %v560_v44, %v526_v47  ;;  %v491_v54 = vadd.f32 %v490_v48, %v330_v37  ;;  %v521_v55 = vadd.f32 %v520_v50, %v360_v36  ;;  %v562_v36 = vld [vmem:[%s1991_s5 + $0x48] sm:$0xff] }
 0x1c0   : > { %v1099_v56 = vpop.f32.mrf.mxu0  ;;  %v1108_v57 = vpop.f32.mrf.mxu1 }
 0x1c1   : > { %v1022_v59 = vmul.f32 -1.442695, %v568_v52  ;;  %v1026_v60 = vmul.f32 -1.442695, %v620_v53  ;;  %v567_v61 = vadd.f32 %v551_v49, %v491_v54  ;;  %v619_v62 = vadd.f32 %v559_v51, %v521_v55 }
 0x1c2   : > { %v506_v63 = vadd.f32 %v1099_v56, %v345_v40  ;;  %v536_v26 = vadd.f32 %v1108_v57, %v375_v58  ;;  %v500_v27 = vpop.f32.mrf.mxu0  ;;  %v530_v28 = vpop.f32.mrf.mxu1 }
 0x1c3   : > { %1302 = vpow2.f32 %v1022_v59  ;;  %v1021_v30 = vmul.f32 -1.442695, %v567_v61  ;;  %v1025_v37 = vmul.f32 -1.442695, %v619_v62  ;;  %v501_v38 = vadd.f32 %v500_v27, %v340_v45  ;;  %v355_v58 = vpop.permute.xlu1 %354  ;;  %v350_v62 = vpop.permute.xlu0 %349 }
 0x1c4   : > { %1304 = vpow2.f32 %v1026_v60  ;;  %v531_v41 = vadd.f32 %v530_v28, %v370_v29  ;;  %v582_v42 = vadd.f32 %v554_v25, %v506_v63  ;;  %v634_v44 = vadd.f32 %v562_v36, %v536_v26  ;;  %v1102_v60 = vpop.f32.mrf.mxu0  ;;  %v1111_v63 = vpop.f32.mrf.mxu1 }
 0x1c5   : > { %1306 = vpow2.f32 %v1021_v30  ;;  %v581_v40 = vadd.f32 %v553_v39, %v501_v38  ;;  %v516_v36 = vadd.f32 %v1102_v60, %v355_v58 }
 0x1c6   : > { %1308 = vpow2.f32 %v1025_v37  ;;  %v633_v46 = vadd.f32 %v561_v43, %v531_v41  ;;  %v1024_v47 = vmul.f32 -1.442695, %v582_v42  ;;  %v1028_v48 = vmul.f32 -1.442695, %v634_v44  ;;  %v510_v29 = vpop.f32.mrf.mxu0  ;;  %v540_v38 = vpop.f32.mrf.mxu1  ;;  %v556_v42 = vld [vmem:[%s1988_s17 + $0x28] sm:$0xff] }
 0x1c7   : > { %v1023_v49 = vmul.f32 -1.442695, %v581_v40  ;;  %v385_v30 = vpop.permute.xlu1 %384  ;;  %v380_v40 = vpop.permute.xlu0 %379 }
 0x1c8   : > { %v1027_v50 = vmul.f32 -1.442695, %v633_v46  ;;  %1310 = vpow2.f32 %v1024_v47  ;;  %v546_v43 = vadd.f32 %v1111_v63, %v385_v30  ;;  %v564_v47 = vld [vmem:[%s1991_s5 + $0x58] sm:$0xff]  ;;  %v617_v63 = vstv %s1984_s14 }
 0x1c9   : > { %1312 = vpow2.f32 %v1028_v48  ;;  %v511_v48 = vadd.f32 %v510_v29, %v350_v62  ;;  %vm618_vm3 = vcmp.lt.s32.totalorder %v617_v63, %v1588_v0 }
 0x1ca   : > { %1314 = vpow2.f32 %v1023_v49 }
 0x1cb   : > { %1316 = vpow2.f32 %v1027_v50 }
 0x1d0   : > { %v1303_v51 = vpop.eup %1302 }
 0x1d1   : > { %v1305_v45 = vpop.eup %1304  ;;  %v576_v52 = vadd.f32 1.0, %v1303_v51  ;;  %v555_v51 = vld [vmem:[%s1988_s17 + $0x20] sm:$0xff] }
 0x1d2   : > { %v1307_v53 = vpop.eup %1306  ;;  %v628_v54 = vadd.f32 1.0, %v1305_v45  ;;  %v541_v45 = vadd.f32 %v540_v38, %v380_v40 }
 0x1d3   : > { %v1309_v55 = vpop.eup %1308  ;;  %1318 = vrcp.f32 %v576_v52  ;;  %v575_v56 = vadd.f32 1.0, %v1307_v53 }
 0x1d4   : > { %1320 = vrcp.f32 %v628_v54  ;;  %v627_v57 = vadd.f32 1.0, %v1309_v55  ;;  %v563_v55 = vld [vmem:[%s1991_s5 + $0x50] sm:$0xff] }
 0x1d5   : > { %1322 = vrcp.f32 %v575_v56  ;;  %v1311_v59 = vpop.eup %1310  ;;  %v610_v56 = vlaneseq }
 0x1d6   : > { %1324 = vrcp.f32 %v627_v57  ;;  %v1313_v61 = vpop.eup %1312  ;;  %v590_v27 = vadd.f32 1.0, %v1311_v59 }
 0x1d7   : > { %v1315_v25 = vpop.eup %1314  ;;  %v642_v28 = vadd.f32 1.0, %v1313_v61  ;;  %v565_v61 = vstv %s1474_s11  ;;  %v611_v62 = vshrl.u32 %v610_v56, 7  ;;  %s318_s11 = sadd.s32 1, %s1474_s11  }
 0x1d8   : > { %v1317_v26 = vpop.eup %1316  ;;  %v589_v37 = vadd.f32 1.0, %v1315_v25  ;;  %1326 = vrcp.f32 %v590_v27  ;;  %vm566_vm2 = vcmp.lt.s32.totalorder %v565_v61, %v1588_v0  ;;  %p317_p2 = scmp.ge.s32.totalorder %s318_s11, %s2243_s0 }
 0x1d9   : > { %v641_v41 = vadd.f32 1.0, %v1317_v26  ;;  %1328 = vrcp.f32 %v642_v28  ;;  %v612_v25 = vsub.s32 0, %v611_v62  ;;  %v609_v26 = vsel %vm566_vm2, 1, %v1525_v35 }
 0x1da   : > { %1330 = vrcp.f32 %v589_v37  ;;  %v661_v37 = vsel %vm618_vm3, 1, %v1525_v35 }
 0x1db   : > { %1332 = vrcp.f32 %v641_v41  ;;  %v613_v30 = vrot.slane %v609_v26, %v612_v25 }
 0x1dd   : > { %vm614_vm4 = vcmp.eq.s32.totalorder %v613_v30, 1 }
 0x1e0   : > { %v1319_v39 = vpop.eup %1318 }
 0x1e1   : > { %v1321_v44 = vpop.eup %1320  ;;  %v596_v46 = vmul.f32 %v1319_v39, %v516_v36 }
 0x1e2   : > { %v1323_v49 = vpop.eup %1322  ;;  %v648_v50 = vmul.f32 %v1321_v44, %v546_v43  ;;  %v665_v43 = vrot.slane %v661_v37, %v612_v25 }
 0x1e3   : > { %v1325_v52 = vpop.eup %1324  ;;  %v598_v53 = vadd.f32 %v596_v46, %v556_v42  ;;  %v595_v54 = vmul.f32 %v1323_v49, %v511_v48 }
 0x1e4   : > { %v650_v57 = vadd.f32 %v648_v50, %v564_v47  ;;  %v647_v58 = vmul.f32 %v1325_v52, %v541_v45  ;;  %vm666_vm5 = vcmp.eq.s32.totalorder %v665_v43, 1 }
 0x1e5   : > { %1334 = vtanh.f32 %v598_v53  ;;  %v597_v59 = vadd.f32 %v595_v54, %v555_v51  ;;  %v1327_v27 = vpop.eup %1326 }
 0x1e6   : > { %1336 = vtanh.f32 %v650_v57  ;;  %v649_v60 = vadd.f32 %v647_v58, %v563_v55  ;;  %v1329_v28 = vpop.eup %1328  ;;  %v602_v38 = vsub.f32 1.0, %v1327_v27  ;;  %v606_v44 = vmul.f32 %v1466_v23, %v1327_v27 }
 0x1e7   : > { %1338 = vtanh.f32 %v597_v59  ;;  %v1331_v29 = vpop.eup %1330  ;;  %v654_v41 = vsub.f32 1.0, %v1329_v28  ;;  %v658_v48 = vmul.f32 %v1458_v21, %v1329_v28 }
 0x1e8   : > { %1340 = vtanh.f32 %v649_v60  ;;  %v1333_v36 = vpop.eup %1332  ;;  %v601_v46 = vsub.f32 1.0, %v1331_v29  ;;  %v605_v35 = vmul.f32 %v1470_v24, %v1331_v29 }
 0x1e9   : > { %v653_v50 = vsub.f32 1.0, %v1333_v36  ;;  %v657_v53 = vmul.f32 %v1462_v22, %v1333_v36 }
 0x1f2   : > { %v1335_v39 = vpop.eup %1334 }
 0x1f3   : > { %v1337_v42 = vpop.eup %1336  ;;  %v604_v40 = vmul.f32 %v1335_v39, %v602_v38 }
 0x1f4   : > { %v1339_v47 = vpop.eup %1338  ;;  %v656_v49 = vmul.f32 %v1337_v42, %v654_v41 }
 0x1f5   : > { %v1341_v51 = vpop.eup %1340  ;;  %v608_v45 = vadd.f32 %v606_v44, %v604_v40  ;;  %v603_v52 = vmul.f32 %v1339_v47, %v601_v46 }
 0x1f6   : > { %v660_v54 = vadd.f32 %v658_v48, %v656_v49  ;;  %v655_v55 = vmul.f32 %v1341_v51, %v653_v50 }
 0x1f7   : > { %v616_v23 = vsel %vm614_vm4, %v608_v45, %v1466_v23   ;;  %v607_v56 = vadd.f32 %v605_v35, %v603_v52  ;;  %320 = sbr.rel (!%p317_p2) target bundleno = 243 (0xf3), region = 95 }
 0x1f8   : > { %672 = vst [vmem:[%s670_s19 + $0x8] sm:$0xff] %v616_v23  ;;  %v659_v57 = vadd.f32 %v657_v53, %v655_v55  ;;  %v668_v21 = vsel %vm666_vm5, %v660_v54, %v1458_v21  }
 0x1f9   : > { %v615_v24 = vsel %vm614_vm4, %v607_v56, %v1470_v24  }
 0x1fa   : > { %671 = vst [vmem:[%s670_s19] sm:$0xff] %v615_v24  ;;  %v667_v22 = vsel %vm666_vm5, %v659_v57, %v1462_v22  }
 0x1fb   : > { %676 = vst [vmem:[%s674_s20 + $0x18] sm:$0xff] %v668_v21  ;;  %675 = vst [vmem:[%s674_s20 + $0x10] sm:$0xff] %v667_v22 }
 0x1fc PF:  { %v2039_v58 = vld [vmem:[%s2250_s7] sm:$0xff]  ;;  %v2044_v59 = vld [vmem:[%s2250_s7 + $0x8] sm:$0xff]  ;;  %v2049_v60 = vld [vmem:[%s2250_s7 + $0x10] sm:$0xff]  ;;  %v2096_v5 = vmov 0.0   ;;  %v2098_v6 = vmov 0.0   ;;  %v2100_v7 = vmov 0.0  }
 0x1fd   :  { %v2054_v24 = vld [vmem:[%s2250_s7 + $0x18] sm:$0xff]  ;;  %v2059_v31 = vld [vmem:[%s2251_s8] sm:$0xff]  ;;  %v2064_v32 = vld [vmem:[%s2251_s8 + $0x8] sm:$0xff]  ;;  %v2102_v8 = vmov 0.0   ;;  %v2104_v9 = vmov 0.0   ;;  %975 = sbr.rel (%p990_p0) target bundleno = 791 (0x317), region = 100 }
 0x1fe   :  { %v2069_v33 = vld [vmem:[%s2251_s8 + $0x10] sm:$0xff]  ;;  %v2074_v34 = vld [vmem:[%s2251_s8 + $0x18] sm:$0xff]  ;;  %v2079_v1 = vld [vmem:[%s2252_s9] sm:$0xff] }
 0x1ff   :  { %v2084_v2 = vld [vmem:[%s2252_s9 + $0x8] sm:$0xff]  ;;  %v2089_v3 = vld [vmem:[%s2252_s9 + $0x10] sm:$0xff]  ;;  %v2094_v4 = vld [vmem:[%s2252_s9 + $0x18] sm:$0xff]  ;;  %s2122_s9 = smov (!%p990_p0), 0  }
 0x202   :  { %v2110_v10 = vmov 0.0   ;;  %v2112_v11 = vmov 0.0   ;;  %v2114_v12 = vmov 0.0   ;;  %v2116_v13 = vmov 0.0  }
 0x203   :  { %v2118_v14 = vmov 0.0   ;;  %v2120_v15 = vmov -1e+30  }
 0x204 LB: > { %vm727_vm6 = vcmask 261120   ;;  %s1032_s21 = sshll.u32 %s1502_s9, 5  ;;  %v1526_v16 = vmov 0   ;;  %v862_v53 = vstv %s1502_s9  ;;  %s692_s9 = sadd.s32 1, %s1502_s9   ;;  %s1502_s9 = sphi %s2122_s9, %s692_s9   ;;  %v1498_v15 = vphi %v2120_v15, %v2261_v15   ;;  %v1494_v14 = vphi %v2118_v14, %v2260_v14   ;;  %v1490_v13 = vphi %v2116_v13, %v2259_v13   ;;  %v1486_v12 = vphi %v2114_v12, %v2258_v12   ;;  %v1482_v11 = vphi %v2112_v11, %v2257_v11   ;;  %v1478_v10 = vphi %v2110_v10, %v2256_v10  }
 0x205   : > { %1120 = vmatprep.mubr.msk.f32.mxu0 %vm727_vm6, %v2039_v58  ;;  %1123 = vmatprep.mubr.msk.f32.mxu1 %vm727_vm6, %v2049_v60  ;;  %s702_s22 = scalar_lea.vmem [#allocation3], %s1032_s21  ;;  %vm2188_vm7 = vcmp.lt.s32.totalorder %v862_v53, %v1588_v0  ;;  %p691_p3 = scmp.ge.s32.totalorder %s692_s9, %s2243_s0 }
 0x206   : > { %1342 = vset.pattern.permute.xlu0 %v1526_v16  ;;  %1343 = vset.pattern.permute.xlu1 %v1526_v16  ;;  %v2152_v17 = vld [vmem:[%s702_s22 + $0x18] sm:$0xff]  ;;  %v2154_v18 = vld [vmem:[%s702_s22 + $0x10] sm:$0xff]  ;;  %v2160_v19 = vld [vmem:[%s702_s22 + $0x8] sm:$0xff] }
 0x207   : > { %709 = vperm.xlu0 %1342, %v2059_v31   ;;  %719 = vperm.xlu1 %1343, %v2069_v33   ;;  %v2166_v20 = vld [vmem:[%s702_s22] sm:$0xff] }
 0x208   : > { %1112 = vmatprep.subr.mxu0 %v2152_v17  ;;  %1138 = vmatprep.subr.mxu1 %v2152_v17 }
 0x209   : > { %1113 = vmatpush3.msra.mxu0 %v2152_v17  ;;  %1142 = vmatpush3.msra.mxu1 %v2152_v17 }
 0x20a   : > { %1114 = vmatprep.subr.mxu0 %v2154_v18  ;;  %1139 = vmatprep.subr.mxu1 %v2154_v18 }
 0x20b   : > { %1115 = vmatpush3.msra.mxu0 %v2154_v18  ;;  %1143 = vmatpush3.msra.mxu1 %v2154_v18 }
 0x20c   : > { %1116 = vmatprep.subr.mxu0 %v2160_v19  ;;  %1140 = vmatprep.subr.mxu1 %v2160_v19 }
 0x20d   : > { %1117 = vmatpush3.msra.mxu0 %v2160_v19  ;;  %1144 = vmatpush3.msra.mxu1 %v2160_v19 }
 0x20e   : > { %1118 = vmatprep.subr.mxu0 %v2166_v20  ;;  %1141 = vmatprep.subr.mxu1 %v2166_v20 }
 0x20f   : > { %1119 = vmatpush3.msra.mxu0 %v2166_v20  ;;  %1145 = vmatpush3.msra.mxu1 %v2166_v20 }
 0x210   : > { %1121 = vmatmul.mubr.msk.f32.vlgmr.msra.gmra.mxu0 %vm727_vm6, %v2044_v59  ;;  %1124 = vmatmul.mubr.msk.f32.vlgmr.msra.gmra.mxu1 %vm727_vm6, %v2054_v24 }
 0x211   : > { %714 = vperm.xlu0 %1342, %v2064_v32   ;;  %724 = vperm.xlu1 %1343, %v2074_v34  }
 0x215   : > { %831 = vperm.xlu0 %1342, %v2079_v1   ;;  %836 = vperm.xlu1 %1343, %v2084_v2  }
 0x219   : > { %841 = vperm.xlu0 %1342, %v2089_v3   ;;  %846 = vperm.xlu1 %1343, %v2094_v4  }
 0x282   : > { %v710_v21 = vpop.permute.xlu0 %709  ;;  %v720_v22 = vpop.permute.xlu1 %719 }
 0x28c   : > { %v715_v23 = vpop.permute.xlu0 %714  ;;  %v725_v63 = vpop.permute.xlu1 %724 }
 0x290   : > { %v832_v37 = vpop.permute.xlu0 %831  ;;  %v837_v38 = vpop.permute.xlu1 %836 }
 0x294   : > { %v842_v40 = vpop.permute.xlu0 %841  ;;  %v847_v48 = vpop.permute.xlu1 %846 }
 0x2d0   : > { %v1122_v61 = vpop.f32.mrf.mxu0  ;;  %v1125_v62 = vpop.f32.mrf.mxu1 }
 0x2d1   : > { %v812_v25 = vadd.f32 %v1122_v61, %v715_v23  ;;  %v822_v28 = vadd.f32 %v1125_v62, %v725_v63 }
 0x2d2   : > { %v806_v26 = vpop.f32.mrf.mxu0  ;;  %v816_v27 = vpop.f32.mrf.mxu1 }
 0x2d3   : > { %1344 = vtanh.f32 %v812_v25  ;;  %v807_v29 = vadd.f32 %v806_v26, %v710_v21  ;;  %v817_v30 = vadd.f32 %v816_v27, %v720_v22  ;;  %v876_v21 = vlaneseq }
 0x2d5   : > { %1346 = vtanh.f32 %v807_v29  ;;  %v877_v22 = vshrl.u32 %v876_v21, 7 }
 0x2d6   : > { %1348 = vtanh.f32 %v817_v30 }
 0x2d7   : > { %1350 = vtanh.f32 %v822_v28  ;;  %v878_v23 = vsub.s32 0, %v877_v22 }
 0x2e0   : > { %v1345_v36 = vpop.eup %1344 }
 0x2e1   : > { %v850_v42 = vmul.f32 %v1345_v36, %v837_v38 }
 0x2e2   : > { %v1347_v39 = vpop.eup %1346 }
 0x2e3   : > { %v1349_v41 = vpop.eup %1348  ;;  %v849_v43 = vmul.f32 %v1347_v39, %v832_v37 }
 0x2e4   : > { %v1351_v44 = vpop.eup %1350  ;;  %v851_v47 = vmul.f32 %v1349_v41, %v842_v40 }
 0x2e5   : > { %v853_v46 = vadd.f32 %v850_v42, %v849_v43  ;;  %v852_v49 = vmul.f32 %v1351_v44, %v847_v48 }
 0x2e7   : > { %v854_v50 = vadd.f32 %v853_v46, %v851_v47 }
 0x2e9   : > { %v855_v51 = vadd.f32 %v854_v50, %v852_v49 }
 0x2eb   : > { %v856_v35 = vrot.slane %v855_v51, 4 }
 0x2ed   : > { %v857_v45 = vadd.f32 %v856_v35, %v855_v51 }
 0x2ef   : > { %v858_v52 = vrot.slane %v857_v45, 2 }
 0x2f1   : > { %v859_v54 = vadd.f32 %v858_v52, %v857_v45 }
 0x2f3   : > { %v860_v55 = vrot.slane %v859_v54, 1 }
 0x2f5   : > { %v861_v57 = vadd.f32 %v860_v55, %v859_v54 }
 0x2f7   : > { %v864_v5 = vsel %vm2188_vm7, %v861_v57, -1e+30 }
 0x2f8   : > { %v865_v6 = vmax.f32 %v1498_v15, %v864_v5  }
 0x2fa   : > { %v866_v7 = vsub.f32 %v1498_v15, %v865_v6  ;;  %v869_v8 = vsub.f32 %v864_v5, %v865_v6 }
 0x2fc   : > { %v867_v9 = vmul.f32 1.442695, %v866_v7  ;;  %v870_v16 = vmul.f32 1.442695, %v869_v8 }
 0x2fe   : > { %1352 = vpow2.f32 %v867_v9 }
 0x2ff   : > { %1354 = vpow2.f32 %v870_v16 }
 0x30b   : > { %v1353_v61 = vpop.eup %1352 }
 0x30c   : > { %v1355_v62 = vpop.eup %1354  ;;  %v873_v63 = vmul.f32 %v1494_v14, %v1353_v61  ;;  %v879_v25 = vrot.slane %v1353_v61, %v878_v23 }
 0x30d   : > { %v872_v26 = vsel %vm2188_vm7, %v1355_v62, 0.0 }
 0x30e   : > { %v874_v27 = vadd.f32 %v873_v63, %v872_v26   ;;  %v881_v28 = vmul.f32 %v1490_v13, %v879_v25  ;;  %v882_v15 = vmul.f32 %v1486_v12, %v879_v25  ;;  %v883_v29 = vmul.f32 %v1482_v11, %v879_v25 }
 0x30f   : > { %v884_v30 = vmul.f32 %v1478_v10, %v879_v25  ;;  %v889_v37 = vrot.slane %v872_v26, %v878_v23 }
 0x310   :  { %v2266_v9 = vmov (%p691_p3), %v874_v27 }
 0x311   : > { %v891_v36 = vmul.f32 %v889_v37, %v2166_v20  ;;  %v892_v38 = vmul.f32 %v889_v37, %v2160_v19  ;;  %v893_v14 = vmul.f32 %v889_v37, %v2154_v18  ;;  %v894_v39 = vmul.f32 %v889_v37, %v2152_v17  ;;  %694 = sbr.rel (!%p691_p3) target bundleno = 516 (0x204), region = 106 }
 0x313   : > { %v895_v41 = vadd.f32 %v891_v36, %v881_v28   ;;  %v896_v42 = vadd.f32 %v892_v38, %v882_v15   ;;  %v897_v43 = vadd.f32 %v893_v14, %v883_v29   ;;  %v898_v44 = vadd.f32 %v894_v39, %v884_v30  }
 0x314   : > { %v2260_v14 = vmov %v874_v27  ;;  %v2261_v15 = vmov %v865_v6 }
 0x315   : > { %v2256_v10 = vmov %v898_v44  ;;  %v2257_v11 = vmov %v897_v43  ;;  %v2258_v12 = vmov %v896_v42  ;;  %v2259_v13 = vmov %v895_v41 }
 0x316   :  { %v2262_v5 = vmov %v898_v44  ;;  %v2263_v6 = vmov %v897_v43  ;;  %v2264_v7 = vmov %v896_v42  ;;  %v2265_v8 = vmov %v895_v41 }
 0x317 PF:  { %v901_v0 = vlaneseq  ;;  %v899_v58 = vmax.f32 %v1522_v9, 1e-20  ;;  %s1527_s0 = smov [#allocation6]   ;;  %v1522_v9 = vphi %v2104_v9, %v2266_v9   ;;  %v1518_v8 = vphi %v2102_v8, %v2265_v8   ;;  %v1514_v7 = vphi %v2100_v7, %v2264_v7   ;;  %v1510_v6 = vphi %v2098_v6, %v2263_v6   ;;  %v1506_v5 = vphi %v2096_v5, %v2262_v5  }
 0x318   :  { %s920_s4 = sshll.u32 %s1527_s0, 4  ;;  %s921_s4 = int_to_ptr.vmem [resolvable:$true] %s920_s4 }
 0x319   :  { %v902_v59 = vshrl.u32 %v901_v0, 7  ;;  %s1358_s24 = scalar_lea.vmem %s921_s4, 512  ;;  %p1363_p5 = scmp.lt.s32.totalorder %s921_s4, %s921_s4 }
 0x31a   :  { %p1359_p4 = scmp.ne.s32.totalorder %s921_s4, %s1358_s24  ;;  %p1364_p6 = scmp.lt.s32.totalorder %s1358_s24, %s1358_s24 }
 0x31b   :  { %v903_v60 = vsub.s32 0, %v902_v59 }
 0x31c   :  { %p1365_p7 = por %p1364_p6, %p1363_p5 }
 0x31d   :  { %v904_v24 = vrot.slane %v899_v58, %v903_v60 }
 0x31e   :  { %p1366_p8 = pnand %p1365_p7, %p1359_p4 }
 0x31f   :  { %1356 = vrcp.f32 %v904_v24 }
 0x32c   :  { %v1357_v31 = vpop.eup %1356 }
 0x32d   :  { %v907_v32 = vmul.f32 %v1518_v8, %v1357_v31  ;;  %v908_v33 = vmul.f32 %v1514_v7, %v1357_v31  ;;  %v909_v34 = vmul.f32 %v1510_v6, %v1357_v31  ;;  %v910_v1 = vmul.f32 %v1506_v5, %v1357_v31 }
 0x32f   :  { %911 = vst [vmem:[#allocation6] sm:$0xff] %v907_v32  ;;  %912 = vst [vmem:[#allocation6 + $0x8] sm:$0xff] %v908_v33 }
 0x330   :  { %913 = vst [vmem:[#allocation6 + $0x10] sm:$0xff] %v909_v34  ;;  %914 = vst [vmem:[#allocation6 + $0x18] sm:$0xff] %v910_v1 }
 0x331   :  { %1369 = shalt.err (!%p1366_p8)
}
 0x332   :  { %s1528_s3 = smov 128   ;;  %s1529_s25 = smov 8  }
 0x333   :  { %926 = dma.vmem_to_hbm [thread:$0]  %s921_s4, 512, %s2253_s10, [#allocation7], %s1528_s3, %s1528_s3, %s1529_s25  }
 0x334   :  { %1450 = dma.done.wait [#allocation7], 512  }
 0x335   :  { %1451 = vsyncadd [#allocation7], 4294966784 }
 0x336   :  { %930 = vsyncpa [#allocation7], 1 }

</bundles_post_ra>
